<compile_context>
chip_gen: v6e
topology: v6e:2x2x1
jax: 0.10.0
libtpu: 0.0.40
codegen_flags: <defaults>
</compile_context>

<pallas_src>
import jax
import jax.numpy as jnp
from jax.experimental import pallas as pl
from jax.experimental.pallas import tpu as pltpu

INPUT_SIZE = 7
HIDDEN = 100
NUM_CLASSES = 1

H_PAD = 128    # 100 -> 128 (lane alignment)


def _round_up(n, m):
    return ((n + m - 1) // m) * m


def mlp_kernel(x_ref, w1_ref, b1_ref, w2_ref, b2_ref, o_ref):
    # x_ref:  (TB, 7)      w1_ref: (7, H_PAD)   b1_ref: (1, H_PAD)
    # w2_ref: (1, H_PAD)   b2_ref: (1, 1) scalar in SMEM
    # Layer 1 on the MXU (K=7; Mosaic pads the contraction internally).
    h = jnp.dot(x_ref[...], w1_ref[...], preferred_element_type=jnp.float32)
    h = jnp.maximum(h + b1_ref[...], 0.0)                  # (TB, 128)
    # Layer 2 (N=1): VPU elementwise multiply + XLU lane reduction; cheaper
    # than a second MXU pass that would use 1/128 of the MXU output width.
    o = jnp.sum(h * w2_ref[...], axis=-1, keepdims=True)   # (TB, 1)
    o_ref[...] = o + b2_ref[0, 0]


def _choose_tile(B, max_tile):
    """Pick the batch tile: single step at small B, even #steps at large B."""
    B8 = _round_up(B, 8)
    if B8 <= max_tile:
        return B8                              # one grid step, no wasted rows
    # Even number of steps (v7x: 2 TensorCores share the "parallel" axis),
    # each step <= max_tile rows.
    n_steps = 2 * pl.cdiv(B8, 2 * max_tile)
    return _round_up(pl.cdiv(B8, n_steps), 8)


def nn3_forward(x, w1_p, b1_p, w2_row, b2_p, *, max_tile=2048):
    """x: (B, INPUT_SIZE) f32 -> (B, NUM_CLASSES) f32. Params are pre-padded."""
    B, F = x.shape
    assert F == INPUT_SIZE
    TB = _choose_tile(B, max_tile)
    B_pad = _round_up(B, TB)
    # Pad the batch dim only when needed (features stay at 7 — no wrapper pad).
    x_in = x if B_pad == B else jnp.zeros((B_pad, F), x.dtype).at[:B].set(x)

    out = pl.pallas_call(
        mlp_kernel,
        out_shape=jax.ShapeDtypeStruct((B_pad, NUM_CLASSES), jnp.float32),
        grid=(B_pad // TB,),
        in_specs=[
            pl.BlockSpec((TB, INPUT_SIZE), lambda i: (i, 0)),      # x tiled over batch
            pl.BlockSpec((INPUT_SIZE, H_PAD), lambda i: (0, 0)),   # w1: VMEM-resident
            pl.BlockSpec((1, H_PAD), lambda i: (0, 0)),            # b1: VMEM-resident
            pl.BlockSpec((1, H_PAD), lambda i: (0, 0)),            # w2 row: VMEM-resident
            pl.BlockSpec(memory_space=pltpu.MemorySpace.SMEM),     # b2: scalar in SMEM
        ],
        out_specs=pl.BlockSpec((TB, NUM_CLASSES), lambda i: (i, 0)),
        compiler_params=pltpu.CompilerParams(
            dimension_semantics=("parallel",),
            vmem_limit_bytes=32 << 20),
    )(x_in, w1_p, b1_p, w2_row, b2_p)
    return out if B_pad == B else out[:B]


def init_params(key):
    """PyTorch nn.Linear default init: U(-1/sqrt(fan_in), +1/sqrt(fan_in))."""
    k1, k2, k3, k4 = jax.random.split(key, 4)
    bound1 = 1.0 / jnp.sqrt(INPUT_SIZE)
    bound2 = 1.0 / jnp.sqrt(HIDDEN)
    w1 = jax.random.uniform(k1, (INPUT_SIZE, HIDDEN), jnp.float32, -bound1, bound1)
    b1 = jax.random.uniform(k2, (HIDDEN,), jnp.float32, -bound1, bound1)
    w2 = jax.random.uniform(k3, (HIDDEN, NUM_CLASSES), jnp.float32, -bound2, bound2)
    b2 = jax.random.uniform(k4, (NUM_CLASSES,), jnp.float32, -bound2, bound2)
    return w1, b1, w2, b2


def pad_params(w1, b1, w2, b2):
    """Zero-pad hidden dim to 128 lanes (exact: padded lanes contribute 0)."""
    w1_p = jnp.zeros((INPUT_SIZE, H_PAD), jnp.float32).at[:, :HIDDEN].set(w1)
    b1_p = jnp.zeros((1, H_PAD), jnp.float32).at[:, :HIDDEN].set(b1.reshape(1, HIDDEN))
    w2_row = jnp.zeros((1, H_PAD), jnp.float32).at[:, :HIDDEN].set(w2.T)   # (1, 128)
    b2_p = b2.reshape(1, NUM_CLASSES).astype(jnp.float32)                  # (1, 1) SMEM scalar
    return w1_p, b1_p, w2_row, b2_p


if __name__ == "__main__":
    key = jax.random.PRNGKey(0)
    kx, kp = jax.random.split(key)
    w1, b1, w2, b2 = init_params(kp)
    w1_p, b1_p, w2_row, b2_p = pad_params(w1, b1, w2, b2)

    def ref_fn(x):
        return jnp.maximum(x @ w1 + b1, 0.0) @ w2 + b2

    # B=8: single-step, no batch pad.  B=13: ragged batch (padded rows sliced).
    # B=4608: multi-step parallel grid path (even #steps for v7x megacore).
    for B in (8, 13, 4608):
        x = jax.random.normal(jax.random.fold_in(kx, B), (B, INPUT_SIZE), jnp.float32)
        out = jax.block_until_ready(nn3_forward(x, w1_p, b1_p, w2_row, b2_p))
        ref = ref_fn(x)
        assert out.shape == (B, NUM_CLASSES)
        assert jnp.allclose(out, ref, atol=1e-5, rtol=1e-5), f"mismatch at B={B}"

    print("KERNEL_OK")
</pallas_src>

<mosaic_0001>
module attributes {stable_mosaic.version = 11 : i64} {
  func.func @mlp_kernel(%arg0: i32, %arg1: memref<8x7xf32, #tpu.memory_space<vmem>>, %arg2: memref<7x128xf32, #tpu.memory_space<vmem>>, %arg3: memref<1x128xf32, #tpu.memory_space<vmem>>, %arg4: memref<1x128xf32, #tpu.memory_space<vmem>>, %arg5: memref<1x1xf32, #tpu.memory_space<smem>>, %arg6: memref<8x1xf32, #tpu.memory_space<vmem>>) attributes {dimension_semantics = [#tpu.dimension_semantics<parallel>], iteration_bounds = array<i64: 1>, scalar_prefetch = 0 : i64, scratch_operands = 0 : i64, tpu.core_type = #tpu.core_type<tc>, window_params = [{transform_indices = @transform_0, window_bounds = array<i64: 8, 7>}, {pipeline_mode = #tpu.pipeline_mode<synchronous>, transform_indices = @transform_1, window_bounds = array<i64: 7, 128>}, {pipeline_mode = #tpu.pipeline_mode<synchronous>, transform_indices = @transform_2, window_bounds = array<i64: 1, 128>}, {pipeline_mode = #tpu.pipeline_mode<synchronous>, transform_indices = @transform_3, window_bounds = array<i64: 1, 128>}, {transform_indices = @transform_4, window_bounds = array<i64: 1, 1>}, {transform_indices = @transform_5, window_bounds = array<i64: 8, 1>}]} {
    %c0 = arith.constant 0 : index
    %c0_0 = arith.constant 0 : index
    %0 = vector.load %arg1[%c0, %c0_0] : memref<8x7xf32, #tpu.memory_space<vmem>>, vector<8x7xf32>
    %c0_1 = arith.constant 0 : index
    %c0_2 = arith.constant 0 : index
    %1 = vector.load %arg2[%c0_1, %c0_2] : memref<7x128xf32, #tpu.memory_space<vmem>>, vector<7x128xf32>
    %cst = arith.constant dense<0.000000e+00> : vector<8x128xf32>
    %2 = tpu.matmul %0, %1, %cst {dimension_numbers = #tpu.dot_dimension_numbers<[1], [0], [0], [1], [0, 0, 1, 1], [], []>} : vector<8x7xf32>, vector<7x128xf32>, vector<8x128xf32> -> vector<8x128xf32>
    %c0_3 = arith.constant 0 : index
    %c0_4 = arith.constant 0 : index
    %3 = vector.load %arg3[%c0_3, %c0_4] : memref<1x128xf32, #tpu.memory_space<vmem>>, vector<1x128xf32>
    %4 = vector.broadcast %3 : vector<1x128xf32> to vector<8x128xf32>
    %5 = arith.addf %2, %4 : vector<8x128xf32>
    %cst_5 = arith.constant 0.000000e+00 : f32
    %6 = vector.broadcast %cst_5 : f32 to vector<8x128xf32>
    %7 = arith.maximumf %5, %6 : vector<8x128xf32>
    %c0_6 = arith.constant 0 : index
    %c0_7 = arith.constant 0 : index
    %8 = vector.load %arg4[%c0_6, %c0_7] : memref<1x128xf32, #tpu.memory_space<vmem>>, vector<1x128xf32>
    %9 = vector.broadcast %8 : vector<1x128xf32> to vector<8x128xf32>
    %10 = arith.mulf %7, %9 : vector<8x128xf32>
    %cst_8 = arith.constant dense<0.000000e+00> : vector<8xf32>
    %11 = vector.multi_reduction <add>, %10, %cst_8 [1] : vector<8x128xf32> to vector<8xf32>
    %12 = vector.shape_cast %11 : vector<8xf32> to vector<8x1xf32>
    %c0_9 = arith.constant 0 : index
    %c0_10 = arith.constant 0 : index
    %13 = memref.load %arg5[%c0_9, %c0_10] : memref<1x1xf32, #tpu.memory_space<smem>>
    %14 = vector.broadcast %13 : f32 to vector<8x1xf32>
    %15 = arith.addf %12, %14 : vector<8x1xf32>
    %c0_11 = arith.constant 0 : index
    %c0_12 = arith.constant 0 : index
    %16 = vector.load %arg6[%c0_11, %c0_12] : memref<8x1xf32, #tpu.memory_space<vmem>>, vector<8x1xf32>
    tpu.vector_store %arg6[%c0_11, %c0_12], %15 {strides = array<i32>} : memref<8x1xf32, #tpu.memory_space<vmem>>, vector<8x1xf32>,
    return
  }
  func.func @transform_0(%arg0: i32) -> (i32, i32) {
    %c0_i32 = arith.constant 0 : i32
    %c0_i32_0 = arith.constant 0 : i32
    return %arg0, %c0_i32 : i32, i32
  }
  func.func @transform_1(%arg0: i32) -> (i32, i32) {
    %c0_i32 = arith.constant 0 : i32
    %c0_i32_0 = arith.constant 0 : i32
    %c0_i32_1 = arith.constant 0 : i32
    return %c0_i32, %c0_i32_0 : i32, i32
  }
  func.func @transform_2(%arg0: i32) -> (i32, i32) {
    %c0_i32 = arith.constant 0 : i32
    %c0_i32_0 = arith.constant 0 : i32
    %c0_i32_1 = arith.constant 0 : i32
    return %c0_i32, %c0_i32_0 : i32, i32
  }
  func.func @transform_3(%arg0: i32) -> (i32, i32) {
    %c0_i32 = arith.constant 0 : i32
    %c0_i32_0 = arith.constant 0 : i32
    %c0_i32_1 = arith.constant 0 : i32
    return %c0_i32, %c0_i32_0 : i32, i32
  }
  func.func @transform_4(%arg0: i32) -> (i32, i32) {
    %c0_i32 = arith.constant 0 : i32
    %c0_i32_0 = arith.constant 0 : i32
    %c0_i32_1 = arith.constant 0 : i32
    return %c0_i32, %c0_i32_0 : i32, i32
  }
  func.func @transform_5(%arg0: i32) -> (i32, i32) {
    %c0_i32 = arith.constant 0 : i32
    %c0_i32_0 = arith.constant 0 : i32
    return %arg0, %c0_i32 : i32, i32
  }
}

</mosaic_0001>

<bundles_post_ra>
// kernel: tpu_custom_call.1
= control target key start
LH: loop header
LB: loop body
LE: loop exit
PB: predicated region body
PF: predicated region fallthrough
CT: control target
= control target key end

     0   :  { %11 = vsyncpa [#allocation4], 0  ;;  %s265_s0 = inlined_call_operand.hbm [shape: f32[8,7], index: 0, kind: input, shape index: {}]   ;;  %s266_s1 = inlined_call_operand.hbm [shape: f32[7,128], index: 1, kind: input, shape index: {}]   ;;  %s267_s2 = inlined_call_operand.vmem [shape: f32[1,128], index: 2, kind: input, shape index: {}]   ;;  %s268_s3 = inlined_call_operand.vmem [shape: f32[1,128], index: 3, kind: input, shape index: {}]   ;;  %s269_s4 = inlined_call_operand.<no memory space> [shape: f32[1,1], index: 4, kind: input, shape index: {}]   ;;  %s270_s5 = inlined_call_operand.vmem [shape: f32[8,1], index: 5, kind: output, shape index: {}]  }
   0x1   :  { %12 = vsyncpa [#allocation6], 0  ;;  %s213_s18 = smov [#allocation3]   ;;  %s214_s20 = smov [#allocation5]  }
   0x2   :  { %s19_s19 = sshll.u32 %s213_s18, 4  ;;  %s29_s21 = sshll.u32 %s214_s20, 4  ;;  %s20_s19 = int_to_ptr.vmem [resolvable:$true] %s19_s19  ;;  %s30_s21 = int_to_ptr.vmem [resolvable:$true] %s29_s21 }
   0x3   :  { %s177_s22 = scalar_lea.vmem %s20_s19, 128  ;;  %p182_p1 = scmp.lt.s32.totalorder %s20_s19, %s20_s19 }
   0x4   :  { %p178_p0 = scmp.ne.s32.totalorder %s20_s19, %s177_s22  ;;  %p183_p2 = scmp.lt.s32.totalorder %s177_s22, %s177_s22 }
   0x6   :  { %p184_p3 = por %p183_p2, %p182_p1 }
   0x8   :  { %p185_p4 = pnand %p184_p3, %p178_p0 }
   0xa   :  { %188 = shalt.err (!%p185_p4)
}
   0xb   :  { %22 = dma.hbm_to_vmem [thread:$0]  %s265_s0, 128, %s20_s19, [#allocation4]  }
   0xc   :  { %s197_s25 = scalar_lea.vmem %s30_s21, 128  ;;  %p202_p6 = scmp.lt.s32.totalorder %s30_s21, %s30_s21 }
   0xd   :  { %p198_p5 = scmp.ne.s32.totalorder %s30_s21, %s197_s25  ;;  %p203_p7 = scmp.lt.s32.totalorder %s197_s25, %s197_s25 }
   0xf   :  { %p204_p8 = por %p203_p7, %p202_p6 }
  0x11   :  { %p205_p9 = pnand %p204_p8, %p198_p5 }
  0x13   :  { %208 = shalt.err (!%p205_p9)
}
  0x14   :  { %32 = dma.hbm_to_vmem [thread:$0]  %s266_s1, 128, %s30_s21, [#allocation6]  }
  0x15   :  { %209 = dma.done.wait [#allocation4], 128  }
  0x16   :  { %210 = vsyncadd [#allocation4], 4294967168 }
  0x17   :  { %211 = dma.done.wait [#allocation6], 128  }
  0x18   :  { %212 = vsyncadd [#allocation6], 4294967168  ;;  %v215_v0 = vmov 0.0   ;;  %vm216_vm0 = vmmov 0   ;;  %vm58_vm1 = vcmask 1046528   ;;  %vm54_vm2 = vcmask 56320  }
  0x19   :  { %160 = vmatprep.subr.mxu0 %v215_v0  ;;  %162 = vmatprep.mubr.msk.f32.mxu0 %vm216_vm0, %v215_v0  ;;  %v46_v1 = vld [vmem:[#allocation5] sm:$0x7f]  ;;  %v45_v2 = vld [vmem:[#allocation3] sm:$0xff]  ;;  %v144_v10 = vstv %s269_s4  ;;  %vm146_vm3 = vcmask 7168  }
  0x1a   :  { %161 = vmatpush3.msk.msra.mxu0 %vm58_vm1, %v46_v1  ;;  %v154_v3 = vld [vmem:[%s267_s2] ss:$0 sm:$0xff] }
  0x1b   :  { %163 = vmatmul.mubr.msk.f32.vlgmr.msra.gmra.mxu0 %vm54_vm2, %v45_v2  ;;  %v157_v7 = vld [vmem:[%s268_s3] ss:$0 sm:$0xff] }
  0xdb   :  { %v128_v4 = vpop.f32.mrf.mxu0 }
  0xdc   :  { %v129_v5 = vadd.f32 %v154_v3, %v128_v4 }
  0xdd   :  { %v164_v6 = vpop.f32.mrf.mxu0 }
  0xde   :  { %v132_v8 = vmax.f32 %v129_v5, 0.0 }
  0xe0   :  { %v140_v9 = vmul.f32 %v157_v7, %v132_v8 }
  0xe2   :  { %141 = vadd.xlane.f32.xlu0 %v140_v9 }
 0x16b   :  { %v142_v11 = vpop.xlane.xlu0 %141 }
 0x16c   :  { %v145_v12 = vadd.f32 %v144_v10, %v142_v11 }
 0x16e   :  { %147 = vst.msk [vmem:[%s270_s5] sm:$0xff] %vm146_vm3, %v145_v12 }
 0x16f   :  { %152 = vsyncpa [#allocation4], 1 }
 0x170   :  { %153 = vsyncpa [#allocation6], 1 }

</bundles_post_ra>
